<compile_context>
chip_gen: v7x
topology: tpu7x:2x2x1
jax: 0.10.0
libtpu: 0.0.40
codegen_flags: <defaults>
</compile_context>

<pallas_src>
import numpy as np
import jax
import jax.numpy as jnp
from jax.experimental import pallas as pl
from jax.experimental.pallas import tpu as pltpu


def _round_up(x, m):
    return -(-x // m) * m


def _vmem_limit_bytes():
    # ~48 MiB on 64-MiB-VMEM parts (v7x), ~96 MiB on 128-MiB parts (v5e/v6e).
    cap = 64 * 1024 * 1024
    try:
        cap = int(pltpu.get_tpu_info().vmem_capacity_bytes)
    except Exception:
        pass
    return int(min(cap * 3 // 4, 100 * 1024 * 1024))


# ----------------------------------------------------------------------------
# Kernel 1: parts projection   out = sum_p x[p] @ w[p] + b
#   Used for: Conv1d as one K=5F matmul (P=1), final Linear (P=2 halves).
#   Weights resident in VMEM, bf16 MXU operands, f32 accumulation.
# ----------------------------------------------------------------------------

def _proj_kernel(x_ref, w_ref, b_ref, o_ref):
    p_parts = x_ref.shape[0]
    acc = jnp.dot(x_ref[0], w_ref[0], preferred_element_type=jnp.float32)
    for p in range(1, p_parts):
        acc = acc + jnp.dot(x_ref[p], w_ref[p],
                            preferred_element_type=jnp.float32)
    o_ref[...] = (acc + b_ref[...]).astype(o_ref.dtype)


def pallas_parts_proj(x, w, b, out_dtype, vmem_limit):
    """x: (P, M, K), w: (P, K, Nout), b: (1, Nout) -> (M, Nout)."""
    P, M, K = x.shape
    P2, K2, Nout = w.shape
    assert (P, K) == (P2, K2)
    assert Nout % 128 == 0, Nout           # lane-dense output stores
    mc_cap = 1024 if vmem_limit >= 64 * 1024 * 1024 else 512
    mc = min(mc_cap, _round_up(M, 8))
    M_pad = _round_up(M, mc)
    if M_pad != M:
        x = jnp.pad(x, ((0, 0), (0, M_pad - M), (0, 0)))
    out = pl.pallas_call(
        _proj_kernel,
        out_shape=jax.ShapeDtypeStruct((M_pad, Nout), out_dtype),
        grid=(M_pad // mc,),
        in_specs=[
            pl.BlockSpec((P, mc, K), lambda m: (0, m, 0)),
            pl.BlockSpec((P, K, Nout), lambda m: (0, 0, 0)),
            pl.BlockSpec((1, Nout), lambda m: (0, 0)),
        ],
        out_specs=pl.BlockSpec((mc, Nout), lambda m: (m, 0)),
        compiler_params=pltpu.CompilerParams(
            dimension_semantics=("parallel",),
            vmem_limit_bytes=vmem_limit),
    )(x, w, b)
    return out[:M] if M_pad != M else out


# ----------------------------------------------------------------------------
# Kernel 2: bidirectional LSTM with the input projection fused per time-chunk.
#   grid = (direction, time-chunk); direction "parallel" (two TCs on v7x),
#   chunks "arbitrary" with h/c carried in VMEM scratch.  Per chunk the kernel
#   does one big  (sc*N, Hp) @ (Hp, 4Hp)  input projection into f32 scratch,
#   then the serial recurrence only needs the (N, Hp) @ (Hp, 4Hp) matmul.
# ----------------------------------------------------------------------------

def _make_bilstm_kernel(seq_chunk, n_chunks, hp, n_pad, unroll):
    H = hp
    N = n_pad

    def kernel(x_ref, wih_ref, whh_ref, b_ref, lens_ref, y_ref,
               gp_sc, h_sc, c_sc):
        d = pl.program_id(0)          # 0 = forward, 1 = backward
        c = pl.program_id(1)          # chunk step in processing order

        # NOTE: relies on the direction axis being the outer (or per-core)
        # axis so that chunks of one direction are processed contiguously.
        @pl.when(c == 0)
        def _():
            h_sc[...] = jnp.zeros_like(h_sc)
            c_sc[...] = jnp.zeros_like(c_sc)

        # fwd processes chunk c, bwd processes chunk n_chunks-1-c
        chunk = c + d * (n_chunks - 1 - 2 * c)
        t_base = chunk * seq_chunk
        lens = lens_ref[...]          # (N, 1) int32
        whh = whh_ref[...]            # (Hp, 4Hp) bf16

        # ---- fused input projection for the whole chunk (f32, stays in VMEM)
        p_parts = x_ref.shape[0]
        acc = jnp.dot(x_ref[0], wih_ref[0],
                      preferred_element_type=jnp.float32)     # (sc*N, 4Hp)
        for p in range(1, p_parts):
            acc = acc + jnp.dot(x_ref[p], wih_ref[p],
                                preferred_element_type=jnp.float32)
        gp_sc[...] = acc + b_ref[...]

        # ---- serial recurrence over the chunk ----
        def step(it, carry):
            # fwd: ascending within chunk; bwd: descending
            t_loc = it + d * (seq_chunk - 1 - 2 * it)
            t_glb = t_base + t_loc
            row0 = pl.multiple_of(t_loc * N, 8)
            h_prev = h_sc[...]
            z = gp_sc[pl.ds(row0, N), :] + jnp.dot(
                h_prev.astype(whh.dtype), whh,
                preferred_element_type=jnp.float32)            # (N, 4Hp)
            i_g = jax.nn.sigmoid(z[:, 0 * H:1 * H])
            f_g = jax.nn.sigmoid(z[:, 1 * H:2 * H])
            g_g = jnp.tanh(z[:, 2 * H:3 * H])
            o_g = jax.nn.sigmoid(z[:, 3 * H:4 * H])
            c_new = f_g * c_sc[...] + i_g * g_g
            h_new = o_g * jnp.tanh(c_new)
            mask = t_glb < lens                                # (N, 1) bool
            c_sc[...] = jnp.where(mask, c_new, c_sc[...])
            h_sc[...] = jnp.where(mask, h_new, h_prev)
            y_ref[t_loc] = jnp.where(mask, h_new, 0.0).astype(y_ref.dtype)
            return carry

        jax.lax.fori_loop(0, seq_chunk, step, 0, unroll=unroll)

    return kernel


def pallas_bilstm(x_parts, w_ih, w_hh, b, lens2d, seq_chunk, t_pad, n_pad, hp,
                  vmem_limit, unroll=2):
    """x_parts: (P, T_pad*N, Hp) bf16; w_ih: (2, P, Hp, 4Hp); w_hh: (2, Hp, 4Hp);
    b: (2, 1, 4Hp) f32; lens2d: (N, 1) int32 -> y: (2, T_pad, N, Hp) bf16."""
    P = x_parts.shape[0]
    N = n_pad
    H4 = 4 * hp
    n_chunks = t_pad // seq_chunk

    def chunkfn(d, c):
        return c + d * (n_chunks - 1 - 2 * c)

    return pl.pallas_call(
        _make_bilstm_kernel(seq_chunk, n_chunks, hp, N, unroll),
        out_shape=jax.ShapeDtypeStruct((2, t_pad, N, hp), jnp.bfloat16),
        grid=(2, n_chunks),
        in_specs=[
            pl.BlockSpec((P, seq_chunk * N, hp),
                         lambda d, c: (0, chunkfn(d, c), 0)),
            pl.BlockSpec((None, P, hp, H4), lambda d, c: (d, 0, 0, 0)),
            pl.BlockSpec((None, hp, H4), lambda d, c: (d, 0, 0)),
            pl.BlockSpec((None, 1, H4), lambda d, c: (d, 0, 0)),
            pl.BlockSpec((N, 1), lambda d, c: (0, 0)),
        ],
        out_specs=pl.BlockSpec((None, seq_chunk, N, hp),
                               lambda d, c: (d, chunkfn(d, c), 0, 0)),
        scratch_shapes=[
            pltpu.VMEM((seq_chunk * N, H4), jnp.float32),   # gate preactivations
            pltpu.VMEM((N, hp), jnp.float32),               # h
            pltpu.VMEM((N, hp), jnp.float32),               # c
        ],
        compiler_params=pltpu.CompilerParams(
            dimension_semantics=("parallel", "arbitrary"),
            vmem_limit_bytes=vmem_limit),
    )(x_parts, w_ih, w_hh, b, lens2d)


def _choose_seq_chunk(t_pack, n_pad, hp, vmem_limit):
    # Resident bytes per timestep in the bilstm kernel (P<=2 input parts):
    #   gp f32 scratch (16*hp) + dot temp (16*hp) + x bf16 dbl-buf (8*hp)
    #   + y bf16 dbl-buf (4*hp), all times n_pad.
    per_step = n_pad * hp * 44
    weights = 3 * 16 * hp * hp                 # w_ih(P=2)+w_hh, bf16, dbl-buf
    budget = max(vmem_limit // 2 - weights, 2 * 1024 * 1024)
    sc = min(256, max(8, budget // max(per_step, 1)))
    sc = min(sc, _round_up(t_pack, 8))
    return int(max(8, (sc // 8) * 8))


# ----------------------------------------------------------------------------
# Parameter helpers (gate-block aware zero padding H -> Hp, multiple of 128)
# ----------------------------------------------------------------------------

def _pad_gate_rows(w, H, Hp):
    """w: (4H, X) -> (4Hp, X), zero-padding inside each of the 4 gate blocks."""
    X = w.shape[1]
    return jnp.pad(w.reshape(4, H, X),
                   ((0, 0), (0, Hp - H), (0, 0))).reshape(4 * Hp, X)


def _pad_gate_vec(b, H, Hp):
    return jnp.pad(b.reshape(4, H), ((0, 0), (0, Hp - H))).reshape(4 * Hp)


def init_params(key, input_size, hidden_size, output_size, num_layers):
    k = 1.0 / np.sqrt(hidden_size)
    keys = iter(jax.random.split(key, 4 + num_layers * 2 * 4 + 2))

    def u(shape):
        return jax.random.uniform(next(keys), shape, jnp.float32, -k, k)

    params = {
        "conv_w": u((hidden_size, input_size, 5)),
        "conv_b": u((hidden_size,)),
        "out_w": u((output_size, 2 * hidden_size)),
        "out_b": u((output_size,)),
        "lstm": [],
    }
    for layer in range(num_layers):
        d_in = hidden_size if layer == 0 else 2 * hidden_size
        layer_p = {}
        for direction in ("fwd", "bwd"):
            layer_p[direction] = {
                "w_ih": u((4 * hidden_size, d_in)),
                "w_hh": u((4 * hidden_size, hidden_size)),
                "b_ih": u((4 * hidden_size,)),
                "b_hh": u((4 * hidden_size,)),
            }
        params["lstm"].append(layer_p)
    return params


# ----------------------------------------------------------------------------
# Forward pass
# ----------------------------------------------------------------------------

def asr_forward(params, x, seq_lens, hidden_size, num_layers):
    """x: (N, F, T) float32; seq_lens: host int array of shape (N,).

    Returns (out, new_seq_lens) with out of shape (T_pack, N, output_size),
    time-major, matching the PyTorch module.
    """
    N, F, T = x.shape
    H = hidden_size
    Hp = _round_up(H, 128)                   # lane-dense hidden size
    N_pad = max(_round_up(N, 8), 16)         # sublane granule (bf16 packing)
    vlim = _vmem_limit_bytes()

    # --- pack_padded_sequence bookkeeping (lengths are host values) ---
    seq_lens_np = np.asarray(seq_lens)
    new_seq_lens = (seq_lens_np + 1) // 2    # ceil(len / 2)
    t_pack = int(new_seq_lens.max())

    seq_chunk = _choose_seq_chunk(t_pack, N_pad, Hp, vlim)
    n_chunks = -(-t_pack // seq_chunk)
    T_pad = n_chunks * seq_chunk

    # --- Conv1d(k=5, s=2, p=2) as a single K=5F matmul (im2col along K) ---
    x_tm = jnp.transpose(x, (2, 0, 1))                       # (T, N, F)
    pad_right = max(0, 2 * T_pad + 1 - T)
    x_tm = jnp.pad(x_tm, ((2, pad_right), (0, N_pad - N), (0, 0)))
    patches = jnp.concatenate(
        [x_tm[k:k + 2 * T_pad:2] for k in range(5)], axis=-1)  # (T_pad, N_pad, 5F)
    patches = patches.reshape(1, T_pad * N_pad, 5 * F).astype(jnp.bfloat16)
    wc = jnp.pad(params["conv_w"], ((0, Hp - H), (0, 0), (0, 0)))   # (Hp, F, 5)
    wc = jnp.transpose(wc, (2, 1, 0)).reshape(1, 5 * F, Hp).astype(jnp.bfloat16)
    cb = jnp.pad(params["conv_b"], (0, Hp - H)).reshape(1, Hp).astype(jnp.float32)
    conv = pallas_parts_proj(patches, wc, cb, jnp.bfloat16, vlim)   # (T_pad*N_pad, Hp)

    lens2d = jnp.asarray(
        np.pad(new_seq_lens, (0, N_pad - N)).astype(np.int32)).reshape(N_pad, 1)

    # --- Bidirectional multi-layer LSTM (input projection fused per chunk) ---
    x_parts = conv[None]                                      # (1, T_pad*N_pad, Hp)
    y = None
    for layer in range(num_layers):
        pf = params["lstm"][layer]["fwd"]
        pb = params["lstm"][layer]["bwd"]
        P = x_parts.shape[0]
        wih_list, whh_list, b_list = [], [], []
        for p_dir in (pf, pb):
            wi = _pad_gate_rows(p_dir["w_ih"], H, Hp)          # (4Hp, d_in)
            if P == 1:
                parts = jnp.pad(wi, ((0, 0), (0, Hp - H))).T[None]      # (1, Hp, 4Hp)
            else:
                wf_ = jnp.pad(wi[:, :H], ((0, 0), (0, Hp - H))).T
                wb_ = jnp.pad(wi[:, H:], ((0, 0), (0, Hp - H))).T
                parts = jnp.stack([wf_, wb_])                           # (2, Hp, 4Hp)
            wih_list.append(parts)
            wh = _pad_gate_rows(p_dir["w_hh"], H, Hp)
            whh_list.append(jnp.pad(wh, ((0, 0), (0, Hp - H))).T)       # (Hp, 4Hp)
            b_list.append(_pad_gate_vec(p_dir["b_ih"] + p_dir["b_hh"],
                                        H, Hp).reshape(1, 4 * Hp))
        w_ih_all = jnp.stack(wih_list).astype(jnp.bfloat16)    # (2, P, Hp, 4Hp)
        w_hh_all = jnp.stack(whh_list).astype(jnp.bfloat16)    # (2, Hp, 4Hp)
        b_all = jnp.stack(b_list).astype(jnp.float32)          # (2, 1, 4Hp)

        y = pallas_bilstm(x_parts, w_ih_all, w_hh_all, b_all, lens2d,
                          seq_chunk, T_pad, N_pad, Hp, vlim)   # (2, T_pad, N, Hp)
        x_parts = y.reshape(2, T_pad * N_pad, Hp)
        # TODO(synk): inter-layer dropout (train-only) is a no-op in eval.

    # --- Output Linear, restricted to the valid packed region ---
    O = params["out_w"].shape[0]
    O_pad = _round_up(O, 128)
    yv = y[:, :t_pack].reshape(2, t_pack * N_pad, Hp)
    wo = jnp.stack([
        jnp.pad(params["out_w"][:, :H], ((0, O_pad - O), (0, Hp - H))).T,
        jnp.pad(params["out_w"][:, H:], ((0, O_pad - O), (0, Hp - H))).T,
    ]).astype(jnp.bfloat16)                                    # (2, Hp, O_pad)
    bo = jnp.pad(params["out_b"], (0, O_pad - O)).reshape(1, O_pad).astype(jnp.float32)
    out = pallas_parts_proj(yv, wo, bo, jnp.float32, vlim)     # (t_pack*N_pad, O_pad)
    out = out.reshape(t_pack, N_pad, O_pad)[:, :N, :O]

    # PyTorch returns int64 lengths; returned here as int32.
    return out, jnp.asarray(new_seq_lens, jnp.int32)


# ----------------------------------------------------------------------------
# Pure-JAX f32 reference (for validation only)
# ----------------------------------------------------------------------------

def reference_forward(params, x, seq_lens, hidden_size, num_layers):
    N, F, T = x.shape
    H = hidden_size
    T_out = (T - 1) // 2 + 1
    xp = jnp.pad(x, ((0, 0), (0, 0), (2, 2)))
    idx = 2 * jnp.arange(T_out)[:, None] + jnp.arange(5)[None, :]
    patches = jnp.transpose(xp[:, :, idx], (0, 2, 1, 3)).reshape(N * T_out, F * 5)
    conv = patches @ params["conv_w"].reshape(H, F * 5).T + params["conv_b"]
    xseq = conv.reshape(N, T_out, H).transpose(1, 0, 2)

    lens = (np.asarray(seq_lens) + 1) // 2
    t_pack = int(lens.max())
    xseq = xseq[:t_pack]
    lens_v = jnp.asarray(lens, jnp.int32)

    def run_dir(seq, p, reverse):
        w_ih, w_hh = p["w_ih"], p["w_hh"]
        bias = p["b_ih"] + p["b_hh"]

        def cell(carry, inp):
            h, c = carry
            x_t, t = inp
            z = x_t @ w_ih.T + h @ w_hh.T + bias
            i = jax.nn.sigmoid(z[:, :H])
            f = jax.nn.sigmoid(z[:, H:2 * H])
            g = jnp.tanh(z[:, 2 * H:3 * H])
            o = jax.nn.sigmoid(z[:, 3 * H:])
            c_new = f * c + i * g
            h_new = o * jnp.tanh(c_new)
            m = (t < lens_v)[:, None]
            c = jnp.where(m, c_new, c)
            h = jnp.where(m, h_new, h)
            return (h, c), jnp.where(m, h_new, 0.0)

        ts = jnp.arange(t_pack)
        if reverse:
            seq, ts = seq[::-1], ts[::-1]
        init = (jnp.zeros((N, H)), jnp.zeros((N, H)))
        _, ys = jax.lax.scan(cell, init, (seq, ts))
        return ys[::-1] if reverse else ys

    h = xseq
    for layer in range(num_layers):
        yf = run_dir(h, params["lstm"][layer]["fwd"], False)
        yb = run_dir(h, params["lstm"][layer]["bwd"], True)
        h = jnp.concatenate([yf, yb], axis=-1)
    out = h @ params["out_w"].T + params["out_b"]
    return out, lens


# ----------------------------------------------------------------------------

if __name__ == "__main__":
    # Small hyperparameters consistent with the module structure.
    input_size, hidden_size, output_size, num_layers = 16, 32, 8, 2
    N, T = 2, 16

    key = jax.random.PRNGKey(0)
    kp, kx = jax.random.split(key)
    params = init_params(kp, input_size, hidden_size, output_size, num_layers)

    x = jax.random.normal(kx, (N, input_size, T), jnp.float32)   # (N, F, T)
    seq_lens = np.array([16, 11], dtype=np.int64)                # sorted descending

    out, new_seq_lens = asr_forward(params, x, seq_lens,
                                    hidden_size=hidden_size,
                                    num_layers=num_layers)
    out = jax.block_until_ready(out)

    expected_T = int((np.asarray(seq_lens).max() + 1) // 2)
    assert out.shape == (expected_T, N, output_size), out.shape
    assert bool(jnp.all(jnp.isfinite(out)))
    # padded timesteps of the shorter sequence equal the output bias (PyTorch semantics)
    assert bool(jnp.allclose(out[-1, 1], params["out_b"], atol=1e-5))
    # compare against a pure-JAX f32 reference (bf16 MXU operands -> loose tol)
    ref_out, _ = reference_forward(params, x, seq_lens, hidden_size, num_layers)
    max_diff = float(jnp.max(jnp.abs(out - ref_out)))
    assert bool(jnp.allclose(out, ref_out, atol=0.1, rtol=0.1)), max_diff

    print("KERNEL_OK")
</pallas_src>

<mosaic_0001>
module attributes {stable_mosaic.version = 11 : i64} {
  func.func @_proj_kernel(%arg0: i32, %arg1: memref<1x128x80xbf16, #tpu.memory_space<vmem>>, %arg2: memref<1x80x128xbf16, #tpu.memory_space<vmem>>, %arg3: memref<1x128xf32, #tpu.memory_space<vmem>>, %arg4: memref<128x128xbf16, #tpu.memory_space<vmem>>) attributes {dimension_semantics = [#tpu.dimension_semantics<parallel>], iteration_bounds = array<i64: 1>, scalar_prefetch = 0 : i64, scratch_operands = 0 : i64, tpu.core_type = #tpu.core_type<tc>, window_params = [{transform_indices = @transform_0, window_bounds = array<i64: 1, 128, 80>}, {pipeline_mode = #tpu.pipeline_mode<synchronous>, transform_indices = @transform_1, window_bounds = array<i64: 1, 80, 128>}, {pipeline_mode = #tpu.pipeline_mode<synchronous>, transform_indices = @transform_2, window_bounds = array<i64: 1, 128>}, {transform_indices = @transform_3, window_bounds = array<i64: 128, 128>}]} {
    %c0 = arith.constant 0 : index
    %c0_0 = arith.constant 0 : index
    %c0_1 = arith.constant 0 : index
    %0 = vector.load %arg1[%c0, %c0_0, %c0_1] : memref<1x128x80xbf16, #tpu.memory_space<vmem>>, vector<1x128x80xbf16>
    %1 = vector.shape_cast %0 : vector<1x128x80xbf16> to vector<128x80xbf16>
    %c0_2 = arith.constant 0 : index
    %c0_3 = arith.constant 0 : index
    %c0_4 = arith.constant 0 : index
    %2 = vector.load %arg2[%c0_2, %c0_3, %c0_4] : memref<1x80x128xbf16, #tpu.memory_space<vmem>>, vector<1x80x128xbf16>
    %3 = vector.shape_cast %2 : vector<1x80x128xbf16> to vector<80x128xbf16>
    %cst = arith.constant dense<0.000000e+00> : vector<128x128xf32>
    %4 = tpu.matmul %1, %3, %cst {dimension_numbers = #tpu.dot_dimension_numbers<[1], [0], [0], [1], [0, 0, 1, 1], [], []>} : vector<128x80xbf16>, vector<80x128xbf16>, vector<128x128xf32> -> vector<128x128xf32>
    %c0_5 = arith.constant 0 : index
    %c0_6 = arith.constant 0 : index
    %5 = vector.load %arg3[%c0_5, %c0_6] : memref<1x128xf32, #tpu.memory_space<vmem>>, vector<1x128xf32>
    %6 = vector.broadcast %5 : vector<1x128xf32> to vector<128x128xf32>
    %7 = arith.addf %4, %6 : vector<128x128xf32>
    %8 = arith.truncf %7 : vector<128x128xf32> to vector<128x128xbf16>
    %c0_7 = arith.constant 0 : index
    %c0_8 = arith.constant 0 : index
    %9 = vector.load %arg4[%c0_7, %c0_8] : memref<128x128xbf16, #tpu.memory_space<vmem>>, vector<128x128xbf16>
    tpu.vector_store %arg4[%c0_7, %c0_8], %8 {strides = array<i32>} : memref<128x128xbf16, #tpu.memory_space<vmem>>, vector<128x128xbf16>,
    return
  }
  func.func @transform_0(%arg0: i32) -> (i32, i32, i32) {
    %c0_i32 = arith.constant 0 : i32
    %c0_i32_0 = arith.constant 0 : i32
    %c0_i32_1 = arith.constant 0 : i32
    return %c0_i32, %arg0, %c0_i32_0 : i32, i32, i32
  }
  func.func @transform_1(%arg0: i32) -> (i32, i32, i32) {
    %c0_i32 = arith.constant 0 : i32
    %c0_i32_0 = arith.constant 0 : i32
    %c0_i32_1 = arith.constant 0 : i32
    %c0_i32_2 = arith.constant 0 : i32
    return %c0_i32, %c0_i32_0, %c0_i32_1 : i32, i32, i32
  }
  func.func @transform_2(%arg0: i32) -> (i32, i32) {
    %c0_i32 = arith.constant 0 : i32
    %c0_i32_0 = arith.constant 0 : i32
    %c0_i32_1 = arith.constant 0 : i32
    return %c0_i32, %c0_i32_0 : i32, i32
  }
  func.func @transform_3(%arg0: i32) -> (i32, i32) {
    %c0_i32 = arith.constant 0 : i32
    %c0_i32_0 = arith.constant 0 : i32
    return %arg0, %c0_i32 : i32, i32
  }
}

</mosaic_0001>

<bundles_post_ra>
// kernel: tpu_custom_call.1
= control target key start
LH: loop header
LB: loop body
LE: loop exit
PB: predicated region body
PF: predicated region fallthrough
CT: control target
= control target key end

     0   :  { %vm119_vm0 = vcmask 654336   ;;  %s612_s0 = inlined_call_operand.vmem [shape: bf16[1,128,80], index: 0, kind: input, shape index: {}]   ;;  %s613_s1 = inlined_call_operand.vmem [shape: bf16[1,80,128], index: 1, kind: input, shape index: {}]   ;;  %s614_s2 = inlined_call_operand.vmem [shape: f32[1,128], index: 2, kind: input, shape index: {}]   ;;  %s615_s3 = inlined_call_operand.hbm [shape: bf16[128,128], index: 3, kind: output, shape index: {}]  }
   0x1   :  { %v490_v0 = vld [vmem:[%s613_s1] sm:$0xff]   ;;  %v491_v1 = vld [vmem:[%s613_s1 + $0x8] sm:$0xff]   ;;  %v492_v2 = vld [vmem:[%s613_s1 + $0x10] sm:$0xff]  }
   0x2   :  { %451 = vmatprep.subr.bf16.mxu0 %v490_v0  ;;  %477 = vmatprep.subr.bf16.mxu1 %v490_v0  ;;  %v495_v3 = vld [vmem:[%s612_s0] sm:$0xff]   ;;  %v493_v5 = vld [vmem:[%s613_s1 + $0x18] sm:$0xff]  }
   0x3   :  { %452 = vmatpush3.bf16.msra.mxu0 %v490_v0  ;;  %482 = vmatpush3.bf16.msra.mxu1 %v490_v0  ;;  %v496_v4 = vld [vmem:[%s612_s0 + $0x20] sm:$0xff]  }
   0x4   :  { %453 = vmatprep.subr.bf16.mxu0 %v491_v1  ;;  %478 = vmatprep.subr.bf16.mxu1 %v491_v1  ;;  %v494_v6 = vld [vmem:[%s613_s1 + $0x20] sm:$0xff]  }
   0x5   :  { %461 = vmatprep.mubr.msk.bf16.mxu0 %vm119_vm0, %v495_v3  ;;  %469 = vmatprep.mubr.msk.bf16.mxu1 %vm119_vm0, %v496_v4 }
   0x7   :  { %454 = vmatpush3.bf16.msra.mxu0 %v491_v1  ;;  %483 = vmatpush3.bf16.msra.mxu1 %v491_v1 }
   0x8   :  { %455 = vmatprep.subr.bf16.mxu0 %v492_v2  ;;  %479 = vmatprep.subr.bf16.mxu1 %v492_v2 }
   0xb   :  { %456 = vmatpush3.bf16.msra.mxu0 %v492_v2  ;;  %484 = vmatpush3.bf16.msra.mxu1 %v492_v2 }
   0xc   :  { %457 = vmatprep.subr.bf16.mxu0 %v493_v5  ;;  %480 = vmatprep.subr.bf16.mxu1 %v493_v5 }
   0xd   :  { %8 = vsyncpa [#allocation3], 0  ;;  %v497_v7 = vld [vmem:[%s612_s0 + $0x8] sm:$0xff]   ;;  %v499_v9 = vld [vmem:[%s612_s0 + $0x10] sm:$0xff]  }
   0xe   :  { %v498_v8 = vld [vmem:[%s612_s0 + $0x28] sm:$0xff]   ;;  %v500_v10 = vld [vmem:[%s612_s0 + $0x30] sm:$0xff]   ;;  %v501_v11 = vld [vmem:[%s612_s0 + $0x18] sm:$0xff]  }
   0xf   :  { %458 = vmatpush3.bf16.msra.mxu0 %v493_v5  ;;  %485 = vmatpush3.bf16.msra.mxu1 %v493_v5  ;;  %v502_v12 = vld [vmem:[%s612_s0 + $0x38] sm:$0xff]   ;;  %v337_v14 = vld [vmem:[%s614_s2] ss:$0 sm:$0xff]  ;;  %s527_s0 = smov [#allocation2]  }
  0x10   :  { %459 = vmatprep.subr.bf16.mxu0 %v494_v6  ;;  %481 = vmatprep.subr.bf16.mxu1 %v494_v6  ;;  %s326_s2 = sshll.u32 %s527_s0, 4  ;;  %s327_s2 = int_to_ptr.vmem [resolvable:$true] %s326_s2 }
  0x11   :  { %s503_s12 = scalar_lea.vmem %s327_s2, 1024  ;;  %p508_p1 = scmp.lt.s32.totalorder %s327_s2, %s327_s2 }
  0x12   :  { %p504_p0 = scmp.ne.s32.totalorder %s327_s2, %s503_s12  ;;  %p509_p2 = scmp.lt.s32.totalorder %s503_s12, %s503_s12 }
  0x13   :  { %460 = vmatpush3.bf16.msra.mxu0 %v494_v6  ;;  %486 = vmatpush3.bf16.msra.mxu1 %v494_v6 }
  0x14   :  { %p510_p3 = por %p509_p2, %p508_p1 }
  0x16   :  { %462 = vmatmul.mubr.msk.bf16.vlgmr.msra.gmra.mrb[0].mxu0 %vm119_vm0, %v497_v7  ;;  %470 = vmatmul.mubr.msk.bf16.vlgmr.msra.gmra.mrb[0].mxu1 %vm119_vm0, %v498_v8  ;;  %p511_p4 = pnand %p510_p3, %p504_p0 }
  0x17   :  { %465 = vmatprep.mubr.msk.bf16.mxu0 %vm119_vm0, %v499_v9  ;;  %473 = vmatprep.mubr.msk.bf16.mxu1 %vm119_vm0, %v500_v10 }
  0x1e   :  { %466 = vmatmul.mubr.msk.bf16.gmra.mrb[4].mxu0 %vm119_vm0, %v501_v11  ;;  %474 = vmatmul.mubr.msk.bf16.gmra.mrb[4].mxu1 %vm119_vm0, %v502_v12 }
  0xe9   :  { %v463_v13 = vpop.f32.mrb[0].mxu0  ;;  %v471_v15 = vpop.f32.mrb[0].mxu1 }
  0xea   :  { %v178_v16 = vpop.f32.mrb[1].mxu0  ;;  %v210_v17 = vpop.f32.mrb[1].mxu1  ;;  %v187_v20 = vadd.f32 %v463_v13, %v337_v14  ;;  %v219_v21 = vadd.f32 %v471_v15, %v337_v14 }
  0xeb   :  { %v464_v18 = vpop.f32.mrb[2].mxu0  ;;  %v472_v19 = vpop.f32.mrb[2].mxu1  ;;  %v179_v26 = vadd.f32 %v337_v14, %v178_v16  ;;  %v211_v27 = vadd.f32 %v337_v14, %v210_v17 }
  0xec   :  { %v190_v22 = vadd.f32 %v464_v18, %v337_v14  ;;  %v222_v23 = vadd.f32 %v472_v19, %v337_v14  ;;  %v181_v24 = vpop.f32.mrb[3].mxu0  ;;  %v213_v25 = vpop.f32.mrb[3].mxu1 }
  0xed   :  { %v182_v28 = vadd.f32 %v337_v14, %v181_v24  ;;  %v214_v29 = vadd.f32 %v337_v14, %v213_v25 }
  0xee   :  { %v399_v30 = vpack.c.bf16 %v190_v22, %v187_v20  ;;  %v419_v31 = vpack.c.bf16 %v222_v23, %v219_v21 }
  0xef   :  { %v394_v32 = vpack.c.bf16 %v182_v28, %v179_v26  ;;  %v414_v33 = vpack.c.bf16 %v214_v29, %v211_v27 }
  0xf0   :  { %431 = vst [vmem:[#allocation2 + $0x8] sm:$0xff] %v399_v30   ;;  %435 = vst [vmem:[#allocation2 + $0x28] sm:$0xff] %v419_v31  }
  0xf1   :  { %395 = vst [vmem:[#allocation2] sm:$0xff] %v394_v32   ;;  %434 = vst [vmem:[#allocation2 + $0x20] sm:$0xff] %v414_v33   ;;  %v467_v34 = vpop.f32.mrb[4].mxu0  ;;  %v475_v35 = vpop.f32.mrb[4].mxu1 }
  0xf2   :  { %v194_v36 = vpop.f32.mrb[5].mxu0  ;;  %v226_v37 = vpop.f32.mrb[5].mxu1  ;;  %v203_v40 = vadd.f32 %v467_v34, %v337_v14  ;;  %v235_v41 = vadd.f32 %v475_v35, %v337_v14 }
  0xf3   :  { %v468_v38 = vpop.f32.mrb[6].mxu0  ;;  %v476_v39 = vpop.f32.mrb[6].mxu1  ;;  %v195_v46 = vadd.f32 %v337_v14, %v194_v36  ;;  %v227_v47 = vadd.f32 %v337_v14, %v226_v37 }
  0xf4   :  { %v206_v42 = vadd.f32 %v468_v38, %v337_v14  ;;  %v238_v43 = vadd.f32 %v476_v39, %v337_v14  ;;  %v197_v44 = vpop.f32.mrb[7].mxu0  ;;  %v229_v45 = vpop.f32.mrb[7].mxu1 }
  0xf5   :  { %v198_v48 = vadd.f32 %v337_v14, %v197_v44  ;;  %v230_v49 = vadd.f32 %v337_v14, %v229_v45 }
  0xf6   :  { %v409_v50 = vpack.c.bf16 %v206_v42, %v203_v40  ;;  %v429_v51 = vpack.c.bf16 %v238_v43, %v235_v41 }
  0xf7   :  { %v404_v52 = vpack.c.bf16 %v198_v48, %v195_v46  ;;  %v424_v53 = vpack.c.bf16 %v230_v49, %v227_v47 }
  0xf8   :  { %433 = vst [vmem:[#allocation2 + $0x18] sm:$0xff] %v409_v50   ;;  %437 = vst [vmem:[#allocation2 + $0x38] sm:$0xff] %v429_v51  }
  0xf9   :  { %432 = vst [vmem:[#allocation2 + $0x10] sm:$0xff] %v404_v52   ;;  %436 = vst [vmem:[#allocation2 + $0x30] sm:$0xff] %v424_v53  }
  0xfa   :  { %514 = shalt.err (!%p511_p4)
}
  0xfb   :  { %s515_s15 = scalar_lea.hbm %s615_s3, 1024 }
  0xfc   :  { %p516_p5 = scmp.ne.s32.totalorder %s615_s3, %s515_s15  ;;  %p519_p6 = scmp.lt.u32.totalorder %s515_s15, %s615_s3 }
  0xfe   :  { %p521_p7 = pnand %p519_p6, %p516_p5 }
 0x100   :  { %524 = shalt.err (!%p521_p7)
}
 0x101   :  { %s528_s20 = smov 64   ;;  %s529_s21 = smov 4  }
 0x102   :  { %332 = dma.vmem_to_hbm [thread:$0]  %s327_s2, 1024, %s615_s3, [#allocation3], %s528_s20, %s528_s20, %s529_s21  }
 0x103   :  { %525 = dma.done.wait [#allocation3], 1024  }
 0x104   :  { %526 = vsyncadd [#allocation3], 4294966272 }
 0x105   :  { %336 = vsyncpa [#allocation3], 1 }

</bundles_post_ra>
